<compile_context>
chip_gen: v7x
topology: tpu7x:2x2x1
jax: 0.10.0
libtpu: 0.0.40
codegen_flags: <defaults>
</compile_context>

<pallas_src>
import jax
import jax.numpy as jnp
from jax.experimental import pallas as pl
from jax.experimental.pallas import tpu as pltpu


def grn_kernel(x_ref, gamma_ref, beta_ref, o_ref):
    # x_ref block: (TN, HW, C); gamma/beta: (1, C); o_ref: (TN, HW, C).
    x = x_ref[...]                                               # native dtype

    # Per-image L2 stats: square in native dtype, accumulate in f32.
    sq = jnp.sum(x * x, axis=1, keepdims=True, dtype=jnp.float32)  # (TN, 1, C)
    gx = jnp.sqrt(sq)                                              # (TN, 1, C)

    # Divisive normalization across channels (stats stay f32).
    gx_mean = jnp.mean(gx, axis=-1, keepdims=True)                 # (TN, 1, 1)
    nx = gx * pl.reciprocal(gx_mean + 1e-6, approx=False)          # (TN, 1, C)
    nx = nx.astype(x.dtype)

    gamma = gamma_ref[...]                                         # (1, C)
    beta = beta_ref[...]                                           # (1, C)

    o_ref[...] = gamma * (x * nx) + beta + x


def _pick_tn(n, bytes_per_image, target_bytes=2 << 20):
    """Pick images-per-step so blocks are ~target_bytes, TN | N, grid >= 2."""
    tn = max(1, min(n, target_bytes // max(bytes_per_image, 1)))
    while tn > 1 and (n % tn != 0 or n // tn < 2):
        tn -= 1
    return tn


def grn_pallas(x, gamma, beta):
    """x: (N, H, W, C); gamma, beta: (1, 1, 1, C)."""
    N, H, W, C = x.shape
    HW = H * W

    # Free layout plumbing in the wrapper: collapse spatial dims, flatten params,
    # and cast params to the elementwise compute dtype once.
    x3 = x.reshape(N, HW, C)
    gamma2d = gamma.reshape(1, C).astype(x.dtype)
    beta2d = beta.reshape(1, C).astype(x.dtype)

    tn = _pick_tn(N, HW * C * x.dtype.itemsize)

    out3 = pl.pallas_call(
        grn_kernel,
        out_shape=jax.ShapeDtypeStruct((N, HW, C), x.dtype),
        grid=(N // tn,),
        in_specs=[
            pl.BlockSpec((tn, HW, C), lambda n: (n, 0, 0)),
            pl.BlockSpec((1, C), lambda n: (0, 0)),
            pl.BlockSpec((1, C), lambda n: (0, 0)),
        ],
        out_specs=pl.BlockSpec((tn, HW, C), lambda n: (n, 0, 0)),
        compiler_params=pltpu.CompilerParams(
            dimension_semantics=("parallel",)),
    )(x3, gamma2d, beta2d)

    return out3.reshape(N, H, W, C)


def grn_reference(x, gamma, beta):
    """Pure-JAX reference matching the PyTorch forward."""
    gx = jnp.sqrt(jnp.sum(x.astype(jnp.float32) ** 2, axis=(1, 2), keepdims=True))
    nx = gx / (jnp.mean(gx, axis=-1, keepdims=True) + 1e-6)
    return (gamma * (x * nx.astype(x.dtype)) + beta + x).astype(x.dtype)


if __name__ == "__main__":
    key = jax.random.PRNGKey(0)
    kx, kg, kb = jax.random.split(key, 3)

    N, H, W, C = 2, 16, 16, 32   # small NHWC input; dim = C = 32

    x = jax.random.normal(kx, (N, H, W, C), dtype=jnp.float32)
    # PyTorch init is zeros -> identity output; use small deterministic random
    # values so the full kernel path is exercised.
    gamma = 0.1 * jax.random.normal(kg, (1, 1, 1, C), dtype=jnp.float32)
    beta = 0.1 * jax.random.normal(kb, (1, 1, 1, C), dtype=jnp.float32)

    out = grn_pallas(x, gamma, beta)
    out = jax.block_until_ready(out)

    ref = grn_reference(x, gamma, beta)
    assert out.shape == ref.shape
    assert jnp.allclose(out, ref, atol=1e-5, rtol=1e-5), \
        f"max err {jnp.max(jnp.abs(out - ref))}"

    print("KERNEL_OK")
</pallas_src>

<mosaic_0001>
module attributes {stable_mosaic.version = 11 : i64} {
  func.func @grn_kernel(%arg0: i32, %arg1: memref<1x256x32xf32, #tpu.memory_space<vmem>>, %arg2: memref<1x32xf32, #tpu.memory_space<vmem>>, %arg3: memref<1x32xf32, #tpu.memory_space<vmem>>, %arg4: memref<1x256x32xf32, #tpu.memory_space<vmem>>) attributes {dimension_semantics = [#tpu.dimension_semantics<parallel>], iteration_bounds = array<i64: 2>, scalar_prefetch = 0 : i64, scratch_operands = 0 : i64, tpu.core_type = #tpu.core_type<tc>, window_params = [{transform_indices = @transform_0, window_bounds = array<i64: 1, 256, 32>}, {pipeline_mode = #tpu.pipeline_mode<synchronous>, transform_indices = @transform_1, window_bounds = array<i64: 1, 32>}, {pipeline_mode = #tpu.pipeline_mode<synchronous>, transform_indices = @transform_2, window_bounds = array<i64: 1, 32>}, {transform_indices = @transform_3, window_bounds = array<i64: 1, 256, 32>}]} {
    %c0 = arith.constant 0 : index
    %c0_0 = arith.constant 0 : index
    %c0_1 = arith.constant 0 : index
    %0 = vector.load %arg1[%c0, %c0_0, %c0_1] : memref<1x256x32xf32, #tpu.memory_space<vmem>>, vector<1x256x32xf32>
    %1 = arith.mulf %0, %0 : vector<1x256x32xf32>
    %cst = arith.constant dense<0.000000e+00> : vector<1x32xf32>
    %2 = vector.multi_reduction <add>, %1, %cst [1] : vector<1x256x32xf32> to vector<1x32xf32>
    %3 = vector.shape_cast %2 : vector<1x32xf32> to vector<1x1x32xf32>
    %4 = math.sqrt %3 : vector<1x1x32xf32>
    %cst_2 = arith.constant dense<0.000000e+00> : vector<1x1xf32>
    %5 = vector.multi_reduction <add>, %4, %cst_2 [2] : vector<1x1x32xf32> to vector<1x1xf32>
    %6 = vector.shape_cast %5 : vector<1x1xf32> to vector<1x1x1xf32>
    %cst_3 = arith.constant 3.200000e+01 : f32
    %7 = vector.broadcast %cst_3 : f32 to vector<1x1x1xf32>
    %8 = arith.divf %6, %7 : vector<1x1x1xf32>
    %cst_4 = arith.constant 9.99999997E-7 : f32
    %9 = vector.broadcast %cst_4 : f32 to vector<1x1x1xf32>
    %10 = arith.addf %8, %9 : vector<1x1x1xf32>
    %11 = tpu.reciprocal %10 : vector<1x1x1xf32> -> vector<1x1x1xf32>
    %12 = vector.broadcast %11 : vector<1x1x1xf32> to vector<1x1x32xf32>
    %13 = arith.mulf %4, %12 : vector<1x1x32xf32>
    %c0_5 = arith.constant 0 : index
    %c0_6 = arith.constant 0 : index
    %14 = vector.load %arg2[%c0_5, %c0_6] : memref<1x32xf32, #tpu.memory_space<vmem>>, vector<1x32xf32>
    %c0_7 = arith.constant 0 : index
    %c0_8 = arith.constant 0 : index
    %15 = vector.load %arg3[%c0_7, %c0_8] : memref<1x32xf32, #tpu.memory_space<vmem>>, vector<1x32xf32>
    %16 = vector.broadcast %13 : vector<1x1x32xf32> to vector<1x256x32xf32>
    %17 = arith.mulf %0, %16 : vector<1x256x32xf32>
    %18 = vector.shape_cast %14 : vector<1x32xf32> to vector<1x1x32xf32>
    %19 = vector.broadcast %18 : vector<1x1x32xf32> to vector<1x256x32xf32>
    %20 = arith.mulf %19, %17 : vector<1x256x32xf32>
    %21 = vector.shape_cast %15 : vector<1x32xf32> to vector<1x1x32xf32>
    %22 = vector.broadcast %21 : vector<1x1x32xf32> to vector<1x256x32xf32>
    %23 = arith.addf %20, %22 : vector<1x256x32xf32>
    %24 = arith.addf %23, %0 : vector<1x256x32xf32>
    %c0_9 = arith.constant 0 : index
    %c0_10 = arith.constant 0 : index
    %c0_11 = arith.constant 0 : index
    %25 = vector.load %arg4[%c0_9, %c0_10, %c0_11] : memref<1x256x32xf32, #tpu.memory_space<vmem>>, vector<1x256x32xf32>
    tpu.vector_store %arg4[%c0_9, %c0_10, %c0_11], %24 {strides = array<i32>} : memref<1x256x32xf32, #tpu.memory_space<vmem>>, vector<1x256x32xf32>,
    return
  }
  func.func @transform_0(%arg0: i32) -> (i32, i32, i32) {
    %c0_i32 = arith.constant 0 : i32
    %c0_i32_0 = arith.constant 0 : i32
    %c0_i32_1 = arith.constant 0 : i32
    return %arg0, %c0_i32, %c0_i32_0 : i32, i32, i32
  }
  func.func @transform_1(%arg0: i32) -> (i32, i32) {
    %c0_i32 = arith.constant 0 : i32
    %c0_i32_0 = arith.constant 0 : i32
    %c0_i32_1 = arith.constant 0 : i32
    return %c0_i32, %c0_i32_0 : i32, i32
  }
  func.func @transform_2(%arg0: i32) -> (i32, i32) {
    %c0_i32 = arith.constant 0 : i32
    %c0_i32_0 = arith.constant 0 : i32
    %c0_i32_1 = arith.constant 0 : i32
    return %c0_i32, %c0_i32_0 : i32, i32
  }
  func.func @transform_3(%arg0: i32) -> (i32, i32, i32) {
    %c0_i32 = arith.constant 0 : i32
    %c0_i32_0 = arith.constant 0 : i32
    %c0_i32_1 = arith.constant 0 : i32
    return %arg0, %c0_i32, %c0_i32_0 : i32, i32, i32
  }
}

</mosaic_0001>

<bundles_post_ra>
// kernel: tpu_custom_call.1
= control target key start
LH: loop header
LB: loop body
LE: loop exit
PB: predicated region body
PF: predicated region fallthrough
CT: control target
= control target key end

     0   :  { %s604_s12 = smov 0   ;;  %s959_s0 = inlined_call_operand.vmem [shape: f32[2,256,32], index: 0, kind: input, shape index: {}]   ;;  %s960_s1 = inlined_call_operand.vmem [shape: f32[1,32], index: 1, kind: input, shape index: {}]   ;;  %s961_s2 = inlined_call_operand.vmem [shape: f32[1,32], index: 2, kind: input, shape index: {}]   ;;  %s962_s3 = inlined_call_operand.vmem [shape: f32[2,256,32], index: 3, kind: output, shape index: {}]  }
   0x1 LB: > { %s549_s13 = sadd.s32 4294967295, %s582_s12   ;;  %p553_p0 = scmp.ge.s32.totalorder %s582_s12, 1  ;;  %s582_s12 = sphi %s604_s12, %s13_s12  }
   0x2   : > { %p137_p1 = scmp.lt.s32.totalorder %s582_s12, 3 }
   0x4   : > { %p138_p2 = pnand %p553_p0, %p137_p1 }
   0x6   : > { %141 = sbr.rel (%p138_p2) target bundleno = 314 (0x13a), region = 32 }
   0xd   : > { %p161_p3 = scmp.lt.s32.totalorder %s549_s13, 1  ;;  %vm235_vm0 = vcmask 261120  }
   0xf   : > { %s1030_s13 = smov (!%p161_p3, %s549_s13), 1 }
  0x10   : > { %s562_s14 = sshll.u32 %s1030_s13, 8 }
  0x11   : > { %s620_s17 = scalar_lea.vmem %s959_s0, %s562_s14  ;;  %s858_s24 = scalar_lea.vmem %s962_s3, %s562_s14 }
  0x12   : > { %v623_v0 = vld [vmem:[%s620_s17] sm:$0xff]  ;;  %v626_v1 = vld [vmem:[%s620_s17 + $0x8] sm:$0xff]  ;;  %v629_v2 = vld [vmem:[%s620_s17 + $0x10] sm:$0xff] }
  0x13   : > { %v632_v3 = vld [vmem:[%s620_s17 + $0x18] sm:$0xff]  ;;  %v203_v4 = vmul.f32 %v623_v0, %v623_v0  ;;  %v204_v5 = vmul.f32 %v626_v1, %v626_v1  ;;  %v205_v6 = vmul.f32 %v629_v2, %v629_v2  ;;  %v641_v7 = vld [vmem:[%s620_s17 + $0x20] sm:$0xff]  ;;  %v645_v9 = vld [vmem:[%s620_s17 + $0x28] sm:$0xff] }
  0x14   : > { %v206_v10 = vmul.f32 %v632_v3, %v632_v3  ;;  %v651_v12 = vld [vmem:[%s620_s17 + $0x30] sm:$0xff]  ;;  %v207_v14 = vmul.f32 %v641_v7, %v641_v7  ;;  %v657_v16 = vld [vmem:[%s620_s17 + $0x38] sm:$0xff]  ;;  %v208_v17 = vmul.f32 %v645_v9, %v645_v9  ;;  %v665_v21 = vld [vmem:[%s620_s17 + $0x40] sm:$0xff] }
  0x15   : > { %v236_v8 = vsel %vm235_vm0, %v203_v4, 0.0  ;;  %v237_v11 = vsel %vm235_vm0, %v204_v5, 0.0  ;;  %v239_v15 = vsel %vm235_vm0, %v205_v6, 0.0  ;;  %v209_v19 = vmul.f32 %v651_v12, %v651_v12  ;;  %v671_v25 = vld [vmem:[%s620_s17 + $0x48] sm:$0xff]  ;;  %v678_v30 = vld [vmem:[%s620_s17 + $0x50] sm:$0xff]  ;;  %v684_v34 = vld [vmem:[%s620_s17 + $0x58] sm:$0xff] }
  0x16   : > { %v238_v13 = vadd.f32 %v237_v11, %v236_v8  ;;  %v241_v20 = vsel %vm235_vm0, %v206_v10, 0.0  ;;  %v210_v23 = vmul.f32 %v657_v16, %v657_v16  ;;  %v243_v24 = vsel %vm235_vm0, %v207_v14, 0.0  ;;  %985 = vst [vmem:[#allocation2_spill] sm:$0xff] %v678_v30  ;;  %986 = vst [vmem:[#allocation3_spill] sm:$0xff] %v684_v34  ;;  %v690_v38 = vld [vmem:[%s620_s17 + $0x60] sm:$0xff]  ;;  %v696_v42 = vld [vmem:[%s620_s17 + $0x68] sm:$0xff] }
  0x17   : > { %v245_v27 = vsel %vm235_vm0, %v208_v17, 0.0  ;;  %v211_v28 = vmul.f32 %v665_v21, %v665_v21  ;;  %v247_v29 = vsel %vm235_vm0, %v209_v19, 0.0  ;;  %v212_v32 = vmul.f32 %v671_v25, %v671_v25  ;;  %987 = vst [vmem:[#allocation4_spill] sm:$0xff] %v690_v38  ;;  %988 = vst [vmem:[#allocation5_spill] sm:$0xff] %v696_v42  ;;  %v702_v46 = vld [vmem:[%s620_s17 + $0x70] sm:$0xff]  ;;  %v708_v50 = vld [vmem:[%s620_s17 + $0x78] sm:$0xff] }
  0x18   : > { %v240_v18 = vadd.f32 %v239_v15, %v238_v13  ;;  %v249_v33 = vsel %vm235_vm0, %v210_v23, 0.0  ;;  %v213_v36 = vmul.f32 %v678_v30, %v678_v30  ;;  %v214_v40 = vmul.f32 %v684_v34, %v684_v34  ;;  %989 = vst [vmem:[#allocation6_spill] sm:$0xff] %v702_v46  ;;  %990 = vst [vmem:[#allocation7_spill] sm:$0xff] %v708_v50  ;;  %v714_v54 = vld [vmem:[%s620_s17 + $0x80] sm:$0xff]  ;;  %v720_v58 = vld [vmem:[%s620_s17 + $0x88] sm:$0xff] }
  0x19   : > { %v251_v37 = vsel %vm235_vm0, %v211_v28, 0.0  ;;  %v253_v41 = vsel %vm235_vm0, %v212_v32, 0.0  ;;  %v215_v44 = vmul.f32 %v690_v38, %v690_v38  ;;  %v216_v48 = vmul.f32 %v696_v42, %v696_v42  ;;  %991 = vst [vmem:[#allocation8_spill] sm:$0xff] %v714_v54  ;;  %992 = vst [vmem:[#allocation9_spill] sm:$0xff] %v720_v58  ;;  %v726_v62 = vld [vmem:[%s620_s17 + $0x90] sm:$0xff]  ;;  %v732_v6 = vld [vmem:[%s620_s17 + $0x98] sm:$0xff] }
  0x1a   : > { %v242_v22 = vadd.f32 %v241_v20, %v240_v18  ;;  %v255_v45 = vsel %vm235_vm0, %v213_v36, 0.0  ;;  %v257_v49 = vsel %vm235_vm0, %v214_v40, 0.0  ;;  %v217_v52 = vmul.f32 %v702_v46, %v702_v46  ;;  %993 = vst [vmem:[#allocation10_spill] sm:$0xff] %v726_v62  ;;  %994 = vst [vmem:[#allocation11_spill] sm:$0xff] %v732_v6  ;;  %v738_v13 = vld [vmem:[%s620_s17 + $0xa0] sm:$0xff]  ;;  %v744_v18 = vld [vmem:[%s620_s17 + $0xa8] sm:$0xff] }
  0x1b   : > { %v259_v53 = vsel %vm235_vm0, %v215_v44, 0.0  ;;  %v218_v56 = vmul.f32 %v708_v50, %v708_v50  ;;  %v261_v57 = vsel %vm235_vm0, %v216_v48, 0.0  ;;  %v219_v60 = vmul.f32 %v714_v54, %v714_v54  ;;  %995 = vst [vmem:[#allocation12_spill] sm:$0xff] %v738_v13  ;;  %996 = vst [vmem:[#allocation13_spill] sm:$0xff] %v744_v18  ;;  %v750_v23 = vld [vmem:[%s620_s17 + $0xb0] sm:$0xff]  ;;  %v756_v28 = vld [vmem:[%s620_s17 + $0xb8] sm:$0xff] }
  0x1c   : > { %v244_v26 = vadd.f32 %v243_v24, %v242_v22  ;;  %v263_v61 = vsel %vm235_vm0, %v217_v52, 0.0  ;;  %v220_v4 = vmul.f32 %v720_v58, %v720_v58  ;;  %v221_v10 = vmul.f32 %v726_v62, %v726_v62  ;;  %997 = vst [vmem:[#allocation14_spill] sm:$0xff] %v750_v23  ;;  %998 = vst [vmem:[#allocation15_spill] sm:$0xff] %v756_v28  ;;  %v774_v44 = vld [vmem:[%s620_s17 + $0xd0] sm:$0xff] }
  0x1d   : > { %v265_v5 = vsel %vm235_vm0, %v218_v56, 0.0  ;;  %v267_v11 = vsel %vm235_vm0, %v219_v60, 0.0  ;;  %v222_v15 = vmul.f32 %v732_v6, %v732_v6  ;;  %v223_v20 = vmul.f32 %v738_v13, %v738_v13  ;;  %1001 = vst [vmem:[#allocation18_spill] sm:$0xff] %v774_v44  ;;  %v792_v60 = vld [vmem:[%s620_s17 + $0xe8] sm:$0xff] }
  0x1e   : > { %v246_v31 = vadd.f32 %v245_v27, %v244_v26  ;;  %v269_v17 = vsel %vm235_vm0, %v220_v4, 0.0  ;;  %v271_v22 = vsel %vm235_vm0, %v221_v10, 0.0  ;;  %v224_v26 = vmul.f32 %v744_v18, %v744_v18  ;;  %1004 = vst [vmem:[#allocation21_spill] sm:$0xff] %v792_v60 }
  0x1f   : > { %v273_v27 = vsel %vm235_vm0, %v222_v15, 0.0  ;;  %v275_v32 = vsel %vm235_vm0, %v223_v20, 0.0  ;;  %v226_v36 = vmul.f32 %v756_v28, %v756_v28  ;;  %v229_v52 = vmul.f32 %v774_v44, %v774_v44 }
  0x20   : > { %v248_v35 = vadd.f32 %v247_v29, %v246_v31  ;;  %v225_v31 = vmul.f32 %v750_v23, %v750_v23  ;;  %v232_v10 = vmul.f32 %v792_v60, %v792_v60 }
  0x21   : > { %v281_v48 = vsel %vm235_vm0, %v226_v36, 0.0  ;;  %v287_v4 = vsel %vm235_vm0, %v229_v52, 0.0 }
  0x22   : > { %v250_v39 = vadd.f32 %v249_v33, %v248_v35  ;;  %v762_v33 = vld [vmem:[%s620_s17 + $0xc0] sm:$0xff] }
  0x23   : > { %999 = vst [vmem:[#allocation16_spill] sm:$0xff] %v762_v33 }
  0x24   : > { %v252_v43 = vadd.f32 %v251_v37, %v250_v39  ;;  %v277_v37 = vsel %vm235_vm0, %v224_v26, 0.0  ;;  %v768_v39 = vld [vmem:[%s620_s17 + $0xc8] sm:$0xff] }
  0x25   : > { %1000 = vst [vmem:[#allocation17_spill] sm:$0xff] %v768_v39 }
  0x26   : > { %v254_v47 = vadd.f32 %v253_v41, %v252_v43  ;;  %v227_v41 = vmul.f32 %v762_v33, %v762_v33  ;;  %v279_v43 = vsel %vm235_vm0, %v225_v31, 0.0 }
  0x28   : > { %v256_v51 = vadd.f32 %v255_v45, %v254_v47  ;;  %v228_v47 = vmul.f32 %v768_v39, %v768_v39 }
  0x2a   : > { %v258_v55 = vadd.f32 %v257_v49, %v256_v51  ;;  %v780_v49 = vld [vmem:[%s620_s17 + $0xd8] sm:$0xff] }
  0x2b   : > { %1002 = vst [vmem:[#allocation19_spill] sm:$0xff] %v780_v49 }
  0x2c   : > { %v260_v59 = vadd.f32 %v259_v53, %v258_v55  ;;  %v283_v53 = vsel %vm235_vm0, %v227_v41, 0.0  ;;  %v786_v55 = vld [vmem:[%s620_s17 + $0xe0] sm:$0xff] }
  0x2d   : > { %1003 = vst [vmem:[#allocation20_spill] sm:$0xff] %v786_v55 }
  0x2e   : > { %v262_v63 = vadd.f32 %v261_v57, %v260_v59  ;;  %v230_v57 = vmul.f32 %v780_v49, %v780_v49  ;;  %v285_v59 = vsel %vm235_vm0, %v228_v47, 0.0 }
  0x30   : > { %v264_v8 = vadd.f32 %v263_v61, %v262_v63  ;;  %v231_v63 = vmul.f32 %v786_v55, %v786_v55 }
  0x32   : > { %v266_v14 = vadd.f32 %v265_v5, %v264_v8  ;;  %v798_v5 = vld [vmem:[%s620_s17 + $0xf0] sm:$0xff] }
  0x33   : > { %1005 = vst [vmem:[#allocation22_spill] sm:$0xff] %v798_v5 }
  0x34   : > { %v268_v19 = vadd.f32 %v267_v11, %v266_v14  ;;  %v289_v11 = vsel %vm235_vm0, %v230_v57, 0.0  ;;  %v804_v14 = vld [vmem:[%s620_s17 + $0xf8] sm:$0xff] }
  0x35   : > { %1006 = vst [vmem:[#allocation23_spill] sm:$0xff] %v804_v14 }
  0x36   : > { %v270_v24 = vadd.f32 %v269_v17, %v268_v19  ;;  %v233_v17 = vmul.f32 %v798_v5, %v798_v5  ;;  %v291_v19 = vsel %vm235_vm0, %v231_v63, 0.0 }
  0x38   : > { %v272_v29 = vadd.f32 %v271_v22, %v270_v24  ;;  %v234_v22 = vmul.f32 %v804_v14, %v804_v14  ;;  %v293_v24 = vsel %vm235_vm0, %v232_v10, 0.0 }
  0x3a   : > { %v274_v35 = vadd.f32 %v273_v27, %v272_v29  ;;  %v295_v27 = vsel %vm235_vm0, %v233_v17, 0.0  ;;  %v297_v31 = vsel %vm235_vm0, %v234_v22, 0.0 }
  0x3c   : > { %v276_v40 = vadd.f32 %v275_v32, %v274_v35 }
  0x3e   : > { %v278_v45 = vadd.f32 %v277_v37, %v276_v40 }
  0x40   : > { %v280_v51 = vadd.f32 %v279_v43, %v278_v45 }
  0x42   : > { %v282_v56 = vadd.f32 %v281_v48, %v280_v51 }
  0x44   : > { %v284_v61 = vadd.f32 %v283_v53, %v282_v56 }
  0x46   : > { %v286_v8 = vadd.f32 %v285_v59, %v284_v61 }
  0x48   : > { %v288_v15 = vadd.f32 %v287_v4, %v286_v8 }
  0x4a   : > { %v290_v20 = vadd.f32 %v289_v11, %v288_v15 }
  0x4c   : > { %v292_v26 = vadd.f32 %v291_v19, %v290_v20 }
  0x4e   : > { %v294_v29 = vadd.f32 %v293_v24, %v292_v26 }
  0x50   : > { %v296_v32 = vadd.f32 %v295_v27, %v294_v29 }
  0x52   : > { %v298_v35 = vadd.f32 %v297_v31, %v296_v32 }
  0x54   : > { %v299_v36 = vrot.slane %v298_v35, 4 }
  0x56   : > { %v300_v37 = vadd.f32 %v299_v36, %v298_v35 }
  0x58   : > { %v301_v40 = vrot.slane %v300_v37, 2 }
  0x5a   : > { %v302_v41 = vadd.f32 %v301_v40, %v300_v37 }
  0x5c   : > { %v303_v43 = vrot.slane %v302_v41, 1 }
  0x5e   : > { %v304_v45 = vadd.f32 %v303_v43, %v302_v41 }
  0x60   : > { %572 = vrsqrt.f32 %v304_v45  ;;  %vm307_vm1 = vcmp.eq.f32.partialorder %v304_v45, inf  ;;  %v310_v48 = vand.u32 2147483648, %v304_v45  ;;  %vm309_vm2 = vcmp.eq.f32.partialorder %v304_v45, 0.0 }
  0x6a   : > { %v573_v47 = vpop.eup %572 }
  0x6b   : > { %v306_v51 = vmul.f32 %v573_v47, %v304_v45 }
  0x6d   : > { %v308_v52 = vsel %vm307_vm1, %v304_v45, %v306_v51  ;;  %v558_v45 = vld [vmem:[%s960_s1] ss:$0 sm:$0xff] }
  0x6e   : > { %v311_v53 = vsel %vm309_vm2, %v310_v48, %v308_v52 }
  0x6f   : > { %v312_v56 = vsel %vm235_vm0, %v311_v53, 0.0 }
  0x70   : > { %313 = vadd.xlane.f32.xlu0 %v312_v56 }
  0xfd   : > { %v314_v57 = vpop.xlane.xlu0 %313 }
  0xfe   : > { %v316_v59 = vmul.f32 0.03125, %v314_v57 }
 0x100   : > { %v317_v61 = vadd.f32 1e-06, %v316_v59 }
 0x102   : > { %574 = vrcp.f32 %v317_v61 }
 0x10c   : > { %v575_v63 = vpop.eup %574 }
 0x10d   : > { %v319_v4 = vmul.f32 %v575_v63, %v311_v53 }
 0x10f   : > { %v322_v8 = vmul.f32 %v319_v4, %v623_v0  ;;  %v323_v10 = vmul.f32 %v319_v4, %v626_v1  ;;  %v324_v11 = vmul.f32 %v319_v4, %v629_v2  ;;  %v325_v15 = vmul.f32 %v319_v4, %v632_v3 }
 0x110   : > { %v326_v17 = vmul.f32 %v319_v4, %v641_v7  ;;  %v327_v19 = vmul.f32 %v319_v4, %v645_v9  ;;  %v328_v20 = vmul.f32 %v319_v4, %v651_v12  ;;  %v329_v22 = vmul.f32 %v319_v4, %v657_v16 }
 0x111   : > { %v330_v24 = vmul.f32 %v319_v4, %v665_v21  ;;  %v331_v26 = vmul.f32 %v319_v4, %v671_v25  ;;  %v332_v27 = vmul.f32 %v319_v4, %v678_v30  ;;  %v333_v29 = vmul.f32 %v319_v4, %v684_v34 }
 0x112   : > { %v334_v31 = vmul.f32 %v319_v4, %v690_v38  ;;  %v335_v32 = vmul.f32 %v319_v4, %v696_v42  ;;  %v336_v35 = vmul.f32 %v319_v4, %v702_v46  ;;  %v337_v36 = vmul.f32 %v319_v4, %v708_v50 }
 0x113   : > { %v338_v37 = vmul.f32 %v319_v4, %v714_v54  ;;  %v339_v40 = vmul.f32 %v319_v4, %v720_v58  ;;  %v340_v41 = vmul.f32 %v319_v4, %v726_v62  ;;  %v341_v43 = vmul.f32 %v319_v4, %v732_v6 }
 0x114   : > { %v342_v47 = vmul.f32 %v319_v4, %v738_v13  ;;  %v343_v48 = vmul.f32 %v319_v4, %v744_v18  ;;  %v344_v51 = vmul.f32 %v319_v4, %v750_v23  ;;  %v345_v52 = vmul.f32 %v319_v4, %v756_v28 }
 0x115   : > { %v346_v53 = vmul.f32 %v319_v4, %v762_v33  ;;  %v347_v56 = vmul.f32 %v319_v4, %v768_v39  ;;  %v348_v57 = vmul.f32 %v319_v4, %v774_v44  ;;  %v349_v59 = vmul.f32 %v319_v4, %v780_v49 }
 0x116   : > { %v350_v61 = vmul.f32 %v319_v4, %v786_v55  ;;  %v351_v63 = vmul.f32 %v319_v4, %v792_v60  ;;  %v352_v13 = vmul.f32 %v319_v4, %v798_v5  ;;  %v353_v18 = vmul.f32 %v319_v4, %v804_v14 }
 0x117   : > { %v360_v6 = vmul.f32 %v558_v45, %v322_v8  ;;  %v361_v23 = vmul.f32 %v558_v45, %v323_v10  ;;  %v362_v62 = vmul.f32 %v558_v45, %v324_v11  ;;  %v363_v28 = vmul.f32 %v558_v45, %v325_v15  ;;  %v559_v8 = vld [vmem:[%s961_s2] ss:$0 sm:$0xff] }
 0x118   : > { %v364_v58 = vmul.f32 %v558_v45, %v326_v17  ;;  %v365_v33 = vmul.f32 %v558_v45, %v327_v19  ;;  %v366_v54 = vmul.f32 %v558_v45, %v328_v20  ;;  %v367_v39 = vmul.f32 %v558_v45, %v329_v22 }
 0x119   : > { %v368_v50 = vmul.f32 %v558_v45, %v330_v24  ;;  %v369_v44 = vmul.f32 %v558_v45, %v331_v26  ;;  %v370_v46 = vmul.f32 %v558_v45, %v332_v27  ;;  %v371_v49 = vmul.f32 %v558_v45, %v333_v29 }
 0x11a   : > { %v372_v42 = vmul.f32 %v558_v45, %v334_v31  ;;  %v373_v55 = vmul.f32 %v558_v45, %v335_v32  ;;  %v374_v38 = vmul.f32 %v558_v45, %v336_v35  ;;  %v375_v60 = vmul.f32 %v558_v45, %v337_v36 }
 0x11b   : > { %v376_v34 = vmul.f32 %v558_v45, %v338_v37  ;;  %v377_v5 = vmul.f32 %v558_v45, %v339_v40  ;;  %v378_v30 = vmul.f32 %v558_v45, %v340_v41  ;;  %v379_v4 = vmul.f32 %v558_v45, %v341_v43 }
 0x11c   : > { %v380_v10 = vmul.f32 %v558_v45, %v342_v47  ;;  %v381_v11 = vmul.f32 %v558_v45, %v343_v48  ;;  %v382_v15 = vmul.f32 %v558_v45, %v344_v51  ;;  %v383_v17 = vmul.f32 %v558_v45, %v345_v52 }
 0x11d   : > { %v384_v19 = vmul.f32 %v558_v45, %v346_v53  ;;  %v385_v20 = vmul.f32 %v558_v45, %v347_v56  ;;  %v386_v22 = vmul.f32 %v558_v45, %v348_v57  ;;  %v387_v24 = vmul.f32 %v558_v45, %v349_v59 }
 0x11e   : > { %v388_v26 = vmul.f32 %v558_v45, %v350_v61  ;;  %v389_v27 = vmul.f32 %v558_v45, %v351_v63  ;;  %v390_v29 = vmul.f32 %v558_v45, %v352_v13  ;;  %v391_v31 = vmul.f32 %v558_v45, %v353_v18 }
 0x11f   : > { %v398_v32 = vadd.f32 %v559_v8, %v360_v6  ;;  %v399_v35 = vadd.f32 %v559_v8, %v361_v23  ;;  %v400_v36 = vadd.f32 %v559_v8, %v362_v62  ;;  %v401_v37 = vadd.f32 %v559_v8, %v363_v28 }
 0x120   : > { %v402_v40 = vadd.f32 %v559_v8, %v364_v58  ;;  %v403_v41 = vadd.f32 %v559_v8, %v365_v33  ;;  %v404_v43 = vadd.f32 %v559_v8, %v366_v54  ;;  %v405_v14 = vadd.f32 %v559_v8, %v367_v39 }
 0x121   : > { %v406_v47 = vadd.f32 %v559_v8, %v368_v50  ;;  %v407_v48 = vadd.f32 %v559_v8, %v369_v44  ;;  %v408_v51 = vadd.f32 %v559_v8, %v370_v46  ;;  %v409_v52 = vadd.f32 %v559_v8, %v371_v49 }
 0x122   : > { %v410_v53 = vadd.f32 %v559_v8, %v372_v42  ;;  %v411_v56 = vadd.f32 %v559_v8, %v373_v55  ;;  %v412_v57 = vadd.f32 %v559_v8, %v374_v38  ;;  %v413_v59 = vadd.f32 %v559_v8, %v375_v60 }
 0x123   : > { %v414_v61 = vadd.f32 %v559_v8, %v376_v34  ;;  %v415_v13 = vadd.f32 %v559_v8, %v377_v5  ;;  %v416_v18 = vadd.f32 %v559_v8, %v378_v30  ;;  %v417_v6 = vadd.f32 %v559_v8, %v379_v4  ;;  %v1007_v4 = vld [vmem:[#allocation2_spill] sm:$0xff] }
 0x124   : > { %v418_v23 = vadd.f32 %v559_v8, %v380_v10  ;;  %v419_v62 = vadd.f32 %v559_v8, %v381_v11  ;;  %v420_v28 = vadd.f32 %v559_v8, %v382_v15  ;;  %v421_v58 = vadd.f32 %v559_v8, %v383_v17  ;;  %v1013_v11 = vld [vmem:[#allocation8_spill] sm:$0xff]  ;;  %v1014_v17 = vld [vmem:[#allocation9_spill] sm:$0xff] }
 0x125   : > { %v422_v33 = vadd.f32 %v559_v8, %v384_v19  ;;  %v423_v54 = vadd.f32 %v559_v8, %v385_v20  ;;  %v424_v39 = vadd.f32 %v559_v8, %v386_v22  ;;  %v425_v50 = vadd.f32 %v559_v8, %v387_v24  ;;  %v1015_v20 = vld [vmem:[#allocation10_spill] sm:$0xff]  ;;  %v1016_v24 = vld [vmem:[#allocation11_spill] sm:$0xff] }
 0x126   : > { %v426_v38 = vadd.f32 %v559_v8, %v388_v26  ;;  %v427_v34 = vadd.f32 %v559_v8, %v389_v27  ;;  %v428_v30 = vadd.f32 %v559_v8, %v390_v29  ;;  %v429_v42 = vadd.f32 %v559_v8, %v391_v31  ;;  %v1008_v8 = vld [vmem:[#allocation3_spill] sm:$0xff]  ;;  %v1017_v27 = vld [vmem:[#allocation12_spill] sm:$0xff]  ;;  %v1018_v31 = vld [vmem:[#allocation13_spill] sm:$0xff] }
 0x127   : > { %v430_v46 = vadd.f32 %v398_v32, %v623_v0  ;;  %v431_v44 = vadd.f32 %v399_v35, %v626_v1  ;;  %v432_v49 = vadd.f32 %v400_v36, %v629_v2  ;;  %v433_v55 = vadd.f32 %v401_v37, %v632_v3  ;;  %v1019_v35 = vld [vmem:[#allocation14_spill] sm:$0xff]  ;;  %v1020_v37 = vld [vmem:[#allocation15_spill] sm:$0xff] }
 0x128   : > { %v434_v60 = vadd.f32 %v402_v40, %v641_v7  ;;  %v435_v5 = vadd.f32 %v403_v41, %v645_v9  ;;  %v436_v45 = vadd.f32 %v404_v43, %v651_v12  ;;  %v437_v63 = vadd.f32 %v405_v14, %v657_v16  ;;  %v1009_v7 = vld [vmem:[#allocation4_spill] sm:$0xff]  ;;  %v1010_v12 = vld [vmem:[#allocation5_spill] sm:$0xff]  ;;  %v1012_v14 = vld [vmem:[#allocation7_spill] sm:$0xff] }
 0x129   : > { %v438_v0 = vadd.f32 %v406_v47, %v665_v21  ;;  %v439_v1 = vadd.f32 %v407_v48, %v671_v25  ;;  %v440_v2 = vadd.f32 %v408_v51, %v1007_v4  ;;  %v441_v3 = vadd.f32 %v409_v52, %v1008_v8  ;;  %462 = vst.msk [vmem:[%s858_s24] sm:$0xff] %vm235_vm0, %v430_v46  ;;  %v1011_v21 = vld [vmem:[#allocation6_spill] sm:$0xff]  ;;  %v1021_v41 = vld [vmem:[#allocation16_spill] sm:$0xff]  ;;  %v1022_v47 = vld [vmem:[#allocation17_spill] sm:$0xff] }
 0x12a   : > { %463 = vst.msk [vmem:[%s858_s24 + $0x8] sm:$0xff] %vm235_vm0, %v431_v44  ;;  %464 = vst.msk [vmem:[%s858_s24 + $0x10] sm:$0xff] %vm235_vm0, %v432_v49  ;;  %v442_v9 = vadd.f32 %v410_v53, %v1009_v7  ;;  %v443_v16 = vadd.f32 %v411_v56, %v1010_v12  ;;  %v444_v25 = vadd.f32 %v412_v57, %v1011_v21  ;;  %v1023_v51 = vld [vmem:[#allocation18_spill] sm:$0xff]  ;;  %v1024_v53 = vld [vmem:[#allocation19_spill] sm:$0xff] }
 0x12b   : > { %465 = vst.msk [vmem:[%s858_s24 + $0x18] sm:$0xff] %vm235_vm0, %v433_v55  ;;  %v445_v10 = vadd.f32 %v413_v59, %v1012_v14  ;;  %466 = vst.msk [vmem:[%s858_s24 + $0x20] sm:$0xff] %vm235_vm0, %v434_v60  ;;  %v446_v15 = vadd.f32 %v414_v61, %v1013_v11  ;;  %v447_v19 = vadd.f32 %v415_v13, %v1014_v17  ;;  %v1025_v57 = vld [vmem:[#allocation20_spill] sm:$0xff]  ;;  %v1026_v61 = vld [vmem:[#allocation21_spill] sm:$0xff] }
 0x12c   : > { %467 = vst.msk [vmem:[%s858_s24 + $0x28] sm:$0xff] %vm235_vm0, %v435_v5  ;;  %468 = vst.msk [vmem:[%s858_s24 + $0x30] sm:$0xff] %vm235_vm0, %v436_v45  ;;  %v448_v22 = vadd.f32 %v416_v18, %v1015_v20  ;;  %v449_v26 = vadd.f32 %v417_v6, %v1016_v24  ;;  %v450_v29 = vadd.f32 %v418_v23, %v1017_v27  ;;  %v1027_v18 = vld [vmem:[#allocation22_spill] sm:$0xff]  ;;  %v1028_v23 = vld [vmem:[#allocation23_spill] sm:$0xff] }
 0x12d   : > { %469 = vst.msk [vmem:[%s858_s24 + $0x38] sm:$0xff] %vm235_vm0, %v437_v63  ;;  %470 = vst.msk [vmem:[%s858_s24 + $0x40] sm:$0xff] %vm235_vm0, %v438_v0  ;;  %v451_v32 = vadd.f32 %v419_v62, %v1018_v31  ;;  %v452_v36 = vadd.f32 %v420_v28, %v1019_v35  ;;  %v453_v40 = vadd.f32 %v421_v58, %v1020_v37 }
 0x12e   : > { %471 = vst.msk [vmem:[%s858_s24 + $0x48] sm:$0xff] %vm235_vm0, %v439_v1  ;;  %472 = vst.msk [vmem:[%s858_s24 + $0x50] sm:$0xff] %vm235_vm0, %v440_v2  ;;  %v454_v43 = vadd.f32 %v422_v33, %v1021_v41  ;;  %v455_v48 = vadd.f32 %v423_v54, %v1022_v47  ;;  %v456_v52 = vadd.f32 %v424_v39, %v1023_v51 }
 0x12f   : > { %473 = vst.msk [vmem:[%s858_s24 + $0x58] sm:$0xff] %vm235_vm0, %v441_v3  ;;  %474 = vst.msk [vmem:[%s858_s24 + $0x60] sm:$0xff] %vm235_vm0, %v442_v9  ;;  %v457_v56 = vadd.f32 %v425_v50, %v1024_v53  ;;  %v458_v59 = vadd.f32 %v426_v38, %v1025_v57  ;;  %v459_v13 = vadd.f32 %v427_v34, %v1026_v61 }
 0x130   : > { %475 = vst.msk [vmem:[%s858_s24 + $0x68] sm:$0xff] %vm235_vm0, %v443_v16  ;;  %476 = vst.msk [vmem:[%s858_s24 + $0x70] sm:$0xff] %vm235_vm0, %v444_v25  ;;  %v460_v6 = vadd.f32 %v428_v30, %v1027_v18  ;;  %v461_v62 = vadd.f32 %v429_v42, %v1028_v23 }
 0x131   : > { %477 = vst.msk [vmem:[%s858_s24 + $0x78] sm:$0xff] %vm235_vm0, %v445_v10  ;;  %478 = vst.msk [vmem:[%s858_s24 + $0x80] sm:$0xff] %vm235_vm0, %v446_v15 }
 0x132   : > { %479 = vst.msk [vmem:[%s858_s24 + $0x88] sm:$0xff] %vm235_vm0, %v447_v19  ;;  %480 = vst.msk [vmem:[%s858_s24 + $0x90] sm:$0xff] %vm235_vm0, %v448_v22 }
 0x133   : > { %481 = vst.msk [vmem:[%s858_s24 + $0x98] sm:$0xff] %vm235_vm0, %v449_v26  ;;  %482 = vst.msk [vmem:[%s858_s24 + $0xa0] sm:$0xff] %vm235_vm0, %v450_v29 }
 0x134   : > { %483 = vst.msk [vmem:[%s858_s24 + $0xa8] sm:$0xff] %vm235_vm0, %v451_v32  ;;  %484 = vst.msk [vmem:[%s858_s24 + $0xb0] sm:$0xff] %vm235_vm0, %v452_v36 }
 0x135   : > { %485 = vst.msk [vmem:[%s858_s24 + $0xb8] sm:$0xff] %vm235_vm0, %v453_v40  ;;  %486 = vst.msk [vmem:[%s858_s24 + $0xc0] sm:$0xff] %vm235_vm0, %v454_v43 }
 0x136   : > { %487 = vst.msk [vmem:[%s858_s24 + $0xc8] sm:$0xff] %vm235_vm0, %v455_v48  ;;  %488 = vst.msk [vmem:[%s858_s24 + $0xd0] sm:$0xff] %vm235_vm0, %v456_v52 }
 0x137   : > { %489 = vst.msk [vmem:[%s858_s24 + $0xd8] sm:$0xff] %vm235_vm0, %v457_v56  ;;  %490 = vst.msk [vmem:[%s858_s24 + $0xe0] sm:$0xff] %vm235_vm0, %v458_v59 }
 0x138   : > { %491 = vst.msk [vmem:[%s858_s24 + $0xe8] sm:$0xff] %vm235_vm0, %v459_v13  ;;  %492 = vst.msk [vmem:[%s858_s24 + $0xf0] sm:$0xff] %vm235_vm0, %v460_v6 }
 0x139   : > { %493 = vst.msk [vmem:[%s858_s24 + $0xf8] sm:$0xff] %vm235_vm0, %v461_v62 }
 0x13a PF: > { %s13_s12 = sadd.s32 1, %s582_s12  }
 0x13b   : > { %p10_p4 = scmp.ge.s32.totalorder %s13_s12, 4  }
 0x13d   :  { %12 = sbr.rel (!%p10_p4) target bundleno = 1 (0x1), region = 62 }

</bundles_post_ra>
